<compile_context>
chip_gen: v6e
topology: v6e:2x2x1
jax: 0.10.0
libtpu: 0.0.40
codegen_flags: <defaults>
</compile_context>

<pallas_src>
import numpy as np
import jax
import jax.numpy as jnp
from jax.experimental import pallas as pl
from jax.experimental.pallas import tpu as pltpu

ALPHA = 1.0 / 2.0 ** 0.5
V_TH = 0.15
TAU = 2.0            # spikingjelly LIFNode default
BN_EPS = 1e-5
LANE = 128


def _round_up(x, m):
    return (x + m - 1) // m * m


def bn_scale(v_th_bn=V_TH):
    # eval-mode tdBN with fresh stats: (x - 0)/sqrt(1+eps) * (alpha*v_th) + 0
    return np.float32(ALPHA * v_th_bn / np.sqrt(1.0 + BN_EPS))


# --------------------------- LIF multi-step kernel ---------------------------
def _lif_kernel(x_ref, s_ref):
    T = x_ref.shape[0]
    decay = np.float32(1.0 - 1.0 / TAU)
    v = jnp.zeros(x_ref.shape[1:], jnp.float32)          # (ROWS, 128) membrane
    for t in range(T):                                   # T small & static -> unrolled
        v = v * decay + x_ref[t]                         # charge (decay_input=False, v_reset=0)
        spk = v >= V_TH                                  # Heaviside spike
        s_ref[t] = spk.astype(s_ref.dtype)               # 0/1 is exact in bf16
        v = jnp.where(spk, 0.0, v)                       # hard reset


def lif_multistep(x5):
    """x5: [T, ...] float -> spikes with the same shape, bfloat16 (exact 0/1)."""
    shape = x5.shape
    T = shape[0]
    M = int(np.prod(shape[1:]))
    R = _round_up(M, LANE) // LANE                       # rows of 128 lanes
    ROWS = 256                                           # (T,256,128) block = 128K elem/step
    if R < ROWS:
        ROWS = _round_up(R, 16)                          # multiple of 16: bf16 sublane pack
    Rp = _round_up(R, ROWS)
    Mp = Rp * LANE

    x = x5.reshape(T, M).astype(jnp.float32)
    if Mp != M:
        # zero-padded lanes never spike (0 < V_TH); sliced away below
        x = jnp.pad(x, ((0, 0), (0, Mp - M)))
    x = x.reshape(T, Rp, LANE)

    spk = pl.pallas_call(
        _lif_kernel,
        out_shape=jax.ShapeDtypeStruct((T, Rp, LANE), jnp.bfloat16),
        grid=(Rp // ROWS,),
        in_specs=[pl.BlockSpec((T, ROWS, LANE), lambda i: (0, i, 0))],
        out_specs=pl.BlockSpec((T, ROWS, LANE), lambda i: (0, i, 0)),
        compiler_params=pltpu.CompilerParams(dimension_semantics=("parallel",)),
    )(x)

    spk = spk.reshape(T, Mp)
    if Mp != M:
        spk = spk[:, :M]
    return spk.reshape(shape)


# ----------------- stride-2 conv + folded tdBN as lane-dense matmul -----------
def _convmm_kernel(w_ref, x_ref, o_ref):
    # single full-K block: no accumulator scratch, no init/finalize branches
    o_ref[...] = jnp.dot(w_ref[...], x_ref[...],
                         preferred_element_type=jnp.float32)


def conv3x3_s2_bn(spikes, w, scale):
    """spikes: [B, Cin, H, W] bf16 (0/1); w: [Cout, Cin, 3, 3] f32 (PyTorch OIHW).
    Returns conv(stride=2, pad=1, no bias)(spikes) * scale as [B, Cout, Ho, Wo] f32."""
    B, Cin, H, W = spikes.shape
    Cout, _, kh, kw = w.shape
    stride, pad = 2, 1
    Ho = (H + 2 * pad - kh) // stride + 1
    Wo = (W + 2 * pad - kw) // stride + 1
    M = B * Ho * Wo
    K = kh * kw * Cin

    # transposed im2col colT[K, M]; K ordered (ki, kj, cin) to match wT below
    xp = jnp.pad(spikes, ((0, 0), (0, 0), (pad, pad), (pad, pad)))
    taps = []
    for ki in range(kh):
        for kj in range(kw):
            sl = xp[:, :, ki:ki + stride * Ho:stride, kj:kj + stride * Wo:stride]
            taps.append(jnp.transpose(sl, (1, 0, 2, 3)).reshape(Cin, M))
    colT = jnp.concatenate(taps, axis=0)                 # [K, M] bf16
    # TODO(synk): colT is still materialized by XLA in HBM (~2.25x the bf16 spike
    # bytes for stride 2); a fully fused in-kernel gather would need manual
    # strided DMA (pl.ANY + make_async_copy) and is left out here.

    # BN scale folded into the weights (free at trace time); bf16 MXU operands.
    wT = (w * scale).transpose(0, 2, 3, 1).reshape(Cout, K).astype(jnp.bfloat16)

    Coutp = _round_up(Cout, 8)                           # sublane pad only
    Kp = _round_up(K, 16)                                # bf16 sublane pack
    TM = 1024                                            # sweepable 512-2048
    Mp = _round_up(M, LANE)
    if Mp < TM:
        TM = Mp
    Mp = _round_up(M, TM)

    if (Coutp, Kp) != (Cout, K):
        wT = jnp.pad(wT, ((0, Coutp - Cout), (0, Kp - K)))
    if (Kp, Mp) != (K, M):
        colT = jnp.pad(colT, ((0, Kp - K), (0, Mp - M)))

    out = pl.pallas_call(
        _convmm_kernel,
        out_shape=jax.ShapeDtypeStruct((Coutp, Mp), jnp.float32),
        grid=(Mp // TM,),
        in_specs=[pl.BlockSpec((Coutp, Kp), lambda i: (0, 0)),   # resident weights
                  pl.BlockSpec((Kp, TM), lambda i: (0, i))],
        out_specs=pl.BlockSpec((Coutp, TM), lambda i: (0, i)),
        compiler_params=pltpu.CompilerParams(dimension_semantics=("parallel",)),
    )(wT, colT)

    if (Coutp, Mp) != (Cout, M):
        out = out[:Cout, :M]
    return jnp.transpose(out.reshape(Cout, B, Ho, Wo), (1, 0, 2, 3))


# ------------------------------- DownSampling --------------------------------
def downsampling_forward(x5, w):
    """x5: [T, N, dim, H, W] f32; w: [2*dim, dim, 3, 3] (PyTorch Conv2d weight)."""
    T, N, C, H, W = x5.shape
    spikes = lif_multistep(x5)                           # [T,N,C,H,W] bf16 spikes
    y = conv3x3_s2_bn(spikes.reshape(T * N, C, H, W), w, bn_scale(V_TH))
    Cout, Ho, Wo = y.shape[1:]
    return y.reshape(T, N, Cout, Ho, Wo)


# ------------------------- pure-JAX reference (check) -------------------------
def downsampling_reference(x5, w):
    T, N = x5.shape[0], x5.shape[1]
    decay = 1.0 - 1.0 / TAU
    v = jnp.zeros(x5.shape[1:], jnp.float32)
    spikes = []
    for t in range(T):
        v = v * decay + x5[t]
        s = (v >= V_TH).astype(jnp.float32)
        spikes.append(s)
        v = v * (1.0 - s)
    s = jnp.stack(spikes, 0).reshape((T * N,) + x5.shape[2:])
    wq = (w * bn_scale(V_TH)).astype(jnp.bfloat16)       # same one-time rounding as kernel
    y = jax.lax.conv_general_dilated(
        s.astype(jnp.bfloat16), wq, window_strides=(2, 2), padding=((1, 1), (1, 1)),
        dimension_numbers=("NCHW", "OIHW", "NCHW"),
        preferred_element_type=jnp.float32)
    return y.reshape((T, N) + y.shape[1:])


if __name__ == "__main__":
    key = jax.random.PRNGKey(0)
    T, N, dim, H, W = 4, 2, 16, 16, 16
    x = jax.random.normal(jax.random.fold_in(key, 1), (T, N, dim, H, W), jnp.float32)
    w = jax.random.normal(jax.random.fold_in(key, 2), (2 * dim, dim, 3, 3),
                          jnp.float32) / np.sqrt(dim * 9)

    fwd = jax.jit(downsampling_forward)
    out = fwd(x, w)
    jax.block_until_ready(out)

    assert out.shape == (T, N, 2 * dim, H // 2, W // 2)
    assert out.dtype == jnp.float32
    assert bool(jnp.all(jnp.isfinite(out)))

    ref = downsampling_reference(x, w)
    np.testing.assert_allclose(np.asarray(out), np.asarray(ref), rtol=1e-3, atol=1e-4)
    print("KERNEL_OK")
</pallas_src>

<mosaic_0001>
module attributes {stable_mosaic.version = 11 : i64} {
  func.func @_lif_kernel(%arg0: i32, %arg1: memref<4x64x128xf32, #tpu.memory_space<vmem>>, %arg2: memref<4x64x128xbf16, #tpu.memory_space<vmem>>) attributes {dimension_semantics = [#tpu.dimension_semantics<parallel>], iteration_bounds = array<i64: 1>, scalar_prefetch = 0 : i64, scratch_operands = 0 : i64, tpu.core_type = #tpu.core_type<tc>, window_params = [{transform_indices = @transform_0, window_bounds = array<i64: 4, 64, 128>}, {transform_indices = @transform_1, window_bounds = array<i64: 4, 64, 128>}]} {
    %cst = arith.constant 0.000000e+00 : f32
    %0 = vector.broadcast %cst : f32 to vector<64x128xf32>
    %cst_0 = arith.constant 5.000000e-01 : f32
    %1 = vector.broadcast %cst_0 : f32 to vector<64x128xf32>
    %2 = arith.mulf %0, %1 : vector<64x128xf32>
    %c0 = arith.constant 0 : index
    %c0_1 = arith.constant 0 : index
    %c0_2 = arith.constant 0 : index
    %3 = vector.load %arg1[%c0, %c0_1, %c0_2] : memref<4x64x128xf32, #tpu.memory_space<vmem>>, vector<1x64x128xf32>
    %4 = vector.shape_cast %3 : vector<1x64x128xf32> to vector<64x128xf32>
    %5 = arith.addf %2, %4 : vector<64x128xf32>
    %cst_3 = arith.constant 1.500000e-01 : f32
    %6 = vector.broadcast %cst_3 : f32 to vector<64x128xf32>
    %7 = arith.cmpf oge, %5, %6 : vector<64x128xf32>
    %8 = arith.extui %7 : vector<64x128xi1> to vector<64x128xi32>
    %9 = arith.sitofp %8 : vector<64x128xi32> to vector<64x128xf32>
    %10 = arith.truncf %9 : vector<64x128xf32> to vector<64x128xbf16>
    %c0_4 = arith.constant 0 : index
    %c0_5 = arith.constant 0 : index
    %c0_6 = arith.constant 0 : index
    %11 = vector.load %arg2[%c0_4, %c0_5, %c0_6] : memref<4x64x128xbf16, #tpu.memory_space<vmem>>, vector<1x64x128xbf16>
    %12 = vector.shape_cast %11 : vector<1x64x128xbf16> to vector<64x128xbf16>
    %13 = vector.shape_cast %10 : vector<64x128xbf16> to vector<1x64x128xbf16>
    tpu.vector_store %arg2[%c0_4, %c0_5, %c0_6], %13 {strides = array<i32>} : memref<4x64x128xbf16, #tpu.memory_space<vmem>>, vector<1x64x128xbf16>,
    %cst_7 = arith.constant 0.000000e+00 : f32
    %14 = vector.broadcast %cst_7 : f32 to vector<64x128xf32>
    %15 = arith.select %7, %14, %5 : vector<64x128xi1>, vector<64x128xf32>
    %cst_8 = arith.constant 5.000000e-01 : f32
    %16 = vector.broadcast %cst_8 : f32 to vector<64x128xf32>
    %17 = arith.mulf %15, %16 : vector<64x128xf32>
    %c1 = arith.constant 1 : index
    %c0_9 = arith.constant 0 : index
    %c0_10 = arith.constant 0 : index
    %18 = vector.load %arg1[%c1, %c0_9, %c0_10] : memref<4x64x128xf32, #tpu.memory_space<vmem>>, vector<1x64x128xf32>
    %19 = vector.shape_cast %18 : vector<1x64x128xf32> to vector<64x128xf32>
    %20 = arith.addf %17, %19 : vector<64x128xf32>
    %cst_11 = arith.constant 1.500000e-01 : f32
    %21 = vector.broadcast %cst_11 : f32 to vector<64x128xf32>
    %22 = arith.cmpf oge, %20, %21 : vector<64x128xf32>
    %23 = arith.extui %22 : vector<64x128xi1> to vector<64x128xi32>
    %24 = arith.sitofp %23 : vector<64x128xi32> to vector<64x128xf32>
    %25 = arith.truncf %24 : vector<64x128xf32> to vector<64x128xbf16>
    %c1_12 = arith.constant 1 : index
    %c0_13 = arith.constant 0 : index
    %c0_14 = arith.constant 0 : index
    %26 = vector.load %arg2[%c1_12, %c0_13, %c0_14] : memref<4x64x128xbf16, #tpu.memory_space<vmem>>, vector<1x64x128xbf16>
    %27 = vector.shape_cast %26 : vector<1x64x128xbf16> to vector<64x128xbf16>
    %28 = vector.shape_cast %25 : vector<64x128xbf16> to vector<1x64x128xbf16>
    tpu.vector_store %arg2[%c1_12, %c0_13, %c0_14], %28 {strides = array<i32>} : memref<4x64x128xbf16, #tpu.memory_space<vmem>>, vector<1x64x128xbf16>,
    %cst_15 = arith.constant 0.000000e+00 : f32
    %29 = vector.broadcast %cst_15 : f32 to vector<64x128xf32>
    %30 = arith.select %22, %29, %20 : vector<64x128xi1>, vector<64x128xf32>
    %cst_16 = arith.constant 5.000000e-01 : f32
    %31 = vector.broadcast %cst_16 : f32 to vector<64x128xf32>
    %32 = arith.mulf %30, %31 : vector<64x128xf32>
    %c2 = arith.constant 2 : index
    %c0_17 = arith.constant 0 : index
    %c0_18 = arith.constant 0 : index
    %33 = vector.load %arg1[%c2, %c0_17, %c0_18] : memref<4x64x128xf32, #tpu.memory_space<vmem>>, vector<1x64x128xf32>
    %34 = vector.shape_cast %33 : vector<1x64x128xf32> to vector<64x128xf32>
    %35 = arith.addf %32, %34 : vector<64x128xf32>
    %cst_19 = arith.constant 1.500000e-01 : f32
    %36 = vector.broadcast %cst_19 : f32 to vector<64x128xf32>
    %37 = arith.cmpf oge, %35, %36 : vector<64x128xf32>
    %38 = arith.extui %37 : vector<64x128xi1> to vector<64x128xi32>
    %39 = arith.sitofp %38 : vector<64x128xi32> to vector<64x128xf32>
    %40 = arith.truncf %39 : vector<64x128xf32> to vector<64x128xbf16>
    %c2_20 = arith.constant 2 : index
    %c0_21 = arith.constant 0 : index
    %c0_22 = arith.constant 0 : index
    %41 = vector.load %arg2[%c2_20, %c0_21, %c0_22] : memref<4x64x128xbf16, #tpu.memory_space<vmem>>, vector<1x64x128xbf16>
    %42 = vector.shape_cast %41 : vector<1x64x128xbf16> to vector<64x128xbf16>
    %43 = vector.shape_cast %40 : vector<64x128xbf16> to vector<1x64x128xbf16>
    tpu.vector_store %arg2[%c2_20, %c0_21, %c0_22], %43 {strides = array<i32>} : memref<4x64x128xbf16, #tpu.memory_space<vmem>>, vector<1x64x128xbf16>,
    %cst_23 = arith.constant 0.000000e+00 : f32
    %44 = vector.broadcast %cst_23 : f32 to vector<64x128xf32>
    %45 = arith.select %37, %44, %35 : vector<64x128xi1>, vector<64x128xf32>
    %cst_24 = arith.constant 5.000000e-01 : f32
    %46 = vector.broadcast %cst_24 : f32 to vector<64x128xf32>
    %47 = arith.mulf %45, %46 : vector<64x128xf32>
    %c3 = arith.constant 3 : index
    %c0_25 = arith.constant 0 : index
    %c0_26 = arith.constant 0 : index
    %48 = vector.load %arg1[%c3, %c0_25, %c0_26] : memref<4x64x128xf32, #tpu.memory_space<vmem>>, vector<1x64x128xf32>
    %49 = vector.shape_cast %48 : vector<1x64x128xf32> to vector<64x128xf32>
    %50 = arith.addf %47, %49 : vector<64x128xf32>
    %cst_27 = arith.constant 1.500000e-01 : f32
    %51 = vector.broadcast %cst_27 : f32 to vector<64x128xf32>
    %52 = arith.cmpf oge, %50, %51 : vector<64x128xf32>
    %53 = arith.extui %52 : vector<64x128xi1> to vector<64x128xi32>
    %54 = arith.sitofp %53 : vector<64x128xi32> to vector<64x128xf32>
    %55 = arith.truncf %54 : vector<64x128xf32> to vector<64x128xbf16>
    %c3_28 = arith.constant 3 : index
    %c0_29 = arith.constant 0 : index
    %c0_30 = arith.constant 0 : index
    %56 = vector.load %arg2[%c3_28, %c0_29, %c0_30] : memref<4x64x128xbf16, #tpu.memory_space<vmem>>, vector<1x64x128xbf16>
    %57 = vector.shape_cast %56 : vector<1x64x128xbf16> to vector<64x128xbf16>
    %58 = vector.shape_cast %55 : vector<64x128xbf16> to vector<1x64x128xbf16>
    tpu.vector_store %arg2[%c3_28, %c0_29, %c0_30], %58 {strides = array<i32>} : memref<4x64x128xbf16, #tpu.memory_space<vmem>>, vector<1x64x128xbf16>,
    return
  }
  func.func @transform_0(%arg0: i32) -> (i32, i32, i32) {
    %c0_i32 = arith.constant 0 : i32
    %c0_i32_0 = arith.constant 0 : i32
    %c0_i32_1 = arith.constant 0 : i32
    return %c0_i32, %arg0, %c0_i32_0 : i32, i32, i32
  }
  func.func @transform_1(%arg0: i32) -> (i32, i32, i32) {
    %c0_i32 = arith.constant 0 : i32
    %c0_i32_0 = arith.constant 0 : i32
    %c0_i32_1 = arith.constant 0 : i32
    return %c0_i32, %arg0, %c0_i32_0 : i32, i32, i32
  }
}

module attributes {stable_mosaic.version = 11 : i64} {
  func.func @_convmm_kernel(%arg0: i32, %arg1: memref<32x144xbf16, #tpu.memory_space<vmem>>, %arg2: memref<144x512xbf16, #tpu.memory_space<vmem>>, %arg3: memref<32x512xf32, #tpu.memory_space<vmem>>) attributes {dimension_semantics = [#tpu.dimension_semantics<parallel>], iteration_bounds = array<i64: 1>, scalar_prefetch = 0 : i64, scratch_operands = 0 : i64, tpu.core_type = #tpu.core_type<tc>, window_params = [{pipeline_mode = #tpu.pipeline_mode<synchronous>, transform_indices = @transform_0, window_bounds = array<i64: 32, 144>}, {transform_indices = @transform_1, window_bounds = array<i64: 144, 512>}, {transform_indices = @transform_2, window_bounds = array<i64: 32, 512>}]} {
    %c0 = arith.constant 0 : index
    %c0_0 = arith.constant 0 : index
    %0 = vector.load %arg1[%c0, %c0_0] : memref<32x144xbf16, #tpu.memory_space<vmem>>, vector<32x144xbf16>
    %c0_1 = arith.constant 0 : index
    %c0_2 = arith.constant 0 : index
    %1 = vector.load %arg2[%c0_1, %c0_2] : memref<144x512xbf16, #tpu.memory_space<vmem>>, vector<144x512xbf16>
    %cst = arith.constant dense<0.000000e+00> : vector<32x512xf32>
    %2 = tpu.matmul %0, %1, %cst {dimension_numbers = #tpu.dot_dimension_numbers<[1], [0], [0], [1], [0, 0, 1, 1], [], []>} : vector<32x144xbf16>, vector<144x512xbf16>, vector<32x512xf32> -> vector<32x512xf32>
    %c0_3 = arith.constant 0 : index
    %c0_4 = arith.constant 0 : index
    %3 = vector.load %arg3[%c0_3, %c0_4] : memref<32x512xf32, #tpu.memory_space<vmem>>, vector<32x512xf32>
    tpu.vector_store %arg3[%c0_3, %c0_4], %2 {strides = array<i32>} : memref<32x512xf32, #tpu.memory_space<vmem>>, vector<32x512xf32>,
    return
  }
  func.func @transform_0(%arg0: i32) -> (i32, i32) {
    %c0_i32 = arith.constant 0 : i32
    %c0_i32_0 = arith.constant 0 : i32
    %c0_i32_1 = arith.constant 0 : i32
    return %c0_i32, %c0_i32_0 : i32, i32
  }
  func.func @transform_1(%arg0: i32) -> (i32, i32) {
    %c0_i32 = arith.constant 0 : i32
    %c0_i32_0 = arith.constant 0 : i32
    return %c0_i32, %arg0 : i32, i32
  }
  func.func @transform_2(%arg0: i32) -> (i32, i32) {
    %c0_i32 = arith.constant 0 : i32
    %c0_i32_0 = arith.constant 0 : i32
    return %c0_i32, %arg0 : i32, i32
  }
}

</mosaic_0001>

<bundles_post_ra>
// kernel: downsampling_forward.2
= control target key start
LH: loop header
LB: loop body
LE: loop exit
PB: predicated region body
PF: predicated region fallthrough
CT: control target
= control target key end

     0   :  { %v594_v5 = vmov 0.0   ;;  %s781_s0 = inlined_call_operand.vmem [shape: f32[4,64,128], index: 0, kind: input, shape index: {}]   ;;  %s782_s1 = inlined_call_operand.vmem [shape: bf16[4,64,128], index: 1, kind: output, shape index: {}]  }
   0x1   :  { %v8_v0 = vld [vmem:[%s781_s0] sm:$0xff]  ;;  %v9_v1 = vld [vmem:[%s781_s0 + $0x8] sm:$0xff]  ;;  %v10_v2 = vld [vmem:[%s781_s0 + $0x10] sm:$0xff] }
   0x2   :  { %vm24_vm0 = vcmp.ge.f32.partialorder %v8_v0, 0.15  ;;  %vm25_vm1 = vcmp.ge.f32.partialorder %v9_v1, 0.15  ;;  %v11_v3 = vld [vmem:[%s781_s0 + $0x18] sm:$0xff]  ;;  %v12_v4 = vld [vmem:[%s781_s0 + $0x20] sm:$0xff] }
   0x3   :  { %v386_v6 = vsel %vm24_vm0, 1.0, %v594_v5  ;;  %v387_v7 = vsel %vm25_vm1, 1.0, %v594_v5  ;;  %v88_v8 = vsel %vm24_vm0, 0.0, %v8_v0  ;;  %v89_v9 = vsel %vm25_vm1, 0.0, %v9_v1  ;;  %v13_v10 = vld [vmem:[%s781_s0 + $0x28] sm:$0xff]  ;;  %v14_v14 = vld [vmem:[%s781_s0 + $0x30] sm:$0xff] }
   0x4   :  { %v531_v11 = vpack.c.bf16 %v387_v7, %v386_v6  ;;  %v96_v12 = vmul.f32 0.5, %v88_v8  ;;  %v97_v13 = vmul.f32 0.5, %v89_v9  ;;  %vm26_vm2 = vcmp.ge.f32.partialorder %v10_v2, 0.15  ;;  %v15_v20 = vld [vmem:[%s781_s0 + $0x38] sm:$0xff]  ;;  %v402_v25 = vld [vmem:[%s781_s0 + $0x40] sm:$0xff] }
   0x5   :  { %vm27_vm3 = vcmp.ge.f32.partialorder %v11_v3, 0.15  ;;  %v388_v15 = vsel %vm26_vm2, 1.0, %v594_v5  ;;  %v90_v16 = vsel %vm26_vm2, 0.0, %v10_v2  ;;  %vm28_vm4 = vcmp.ge.f32.partialorder %v12_v4, 0.15 }
   0x6   :  { %532 = vst [vmem:[%s782_s1] sm:$0xff] %v531_v11   ;;  %v389_v17 = vsel %vm27_vm3, 1.0, %v594_v5  ;;  %v91_v18 = vsel %vm27_vm3, 0.0, %v11_v3  ;;  %v98_v19 = vmul.f32 0.5, %v90_v16  ;;  %vm29_vm5 = vcmp.ge.f32.partialorder %v13_v10, 0.15  ;;  %v403_v26 = vld [vmem:[%s781_s0 + $0x48] sm:$0xff] }
   0x7   :  { %v534_v21 = vpack.c.bf16 %v389_v17, %v388_v15  ;;  %v99_v22 = vmul.f32 0.5, %v91_v18  ;;  %v390_v23 = vsel %vm28_vm4, 1.0, %v594_v5  ;;  %v391_v24 = vsel %vm29_vm5, 1.0, %v594_v5  ;;  %v404_v30 = vld [vmem:[%s781_s0 + $0x50] sm:$0xff]  ;;  %v405_v31 = vld [vmem:[%s781_s0 + $0x58] sm:$0xff]  ;;  %v406_v35 = vld [vmem:[%s781_s0 + $0x60] sm:$0xff] }
   0x8   :  { %v537_v27 = vpack.c.bf16 %v391_v24, %v390_v23  ;;  %v92_v28 = vsel %vm28_vm4, 0.0, %v12_v4  ;;  %v93_v29 = vsel %vm29_vm5, 0.0, %v13_v10  ;;  %vm30_vm6 = vcmp.ge.f32.partialorder %v14_v14, 0.15  ;;  %v407_v40 = vld [vmem:[%s781_s0 + $0x68] sm:$0xff]  ;;  %v408_v54 = vld [vmem:[%s781_s0 + $0x70] sm:$0xff] }
   0x9   :  { %578 = vst [vmem:[%s782_s1 + $0x8] sm:$0xff] %v534_v21   ;;  %v100_v32 = vmul.f32 0.5, %v92_v28  ;;  %v101_v33 = vmul.f32 0.5, %v93_v29  ;;  %vm31_vm7 = vcmp.ge.f32.partialorder %v15_v20, 0.15  ;;  %v392_v34 = vsel %vm30_vm6, 1.0, %v594_v5 }
   0xa   :  { %579 = vst [vmem:[%s782_s1 + $0x10] sm:$0xff] %v537_v27   ;;  %v393_v36 = vsel %vm31_vm7, 1.0, %v594_v5  ;;  %v94_v37 = vsel %vm30_vm6, 0.0, %v14_v14  ;;  %v95_v38 = vsel %vm31_vm7, 0.0, %v15_v20  ;;  %v113_v39 = vadd.f32 %v402_v25, %v96_v12  ;;  %v409_v58 = vld [vmem:[%s781_s0 + $0x78] sm:$0xff]  ;;  %v434_v59 = vld [vmem:[%s781_s0 + $0x80] sm:$0xff] }
   0xb   :  { %v540_v41 = vpack.c.bf16 %v393_v36, %v392_v34  ;;  %v102_v42 = vmul.f32 0.5, %v94_v37  ;;  %v103_v43 = vmul.f32 0.5, %v95_v38  ;;  %v114_v44 = vadd.f32 %v403_v26, %v97_v13  ;;  %v435_v63 = vld [vmem:[%s781_s0 + $0x88] sm:$0xff]  ;;  %v436_v3 = vld [vmem:[%s781_s0 + $0x90] sm:$0xff]  ;;  %v437_v4 = vld [vmem:[%s781_s0 + $0x98] sm:$0xff] }
   0xc   :  { %vm121_vm8 = vcmp.ge.f32.partialorder %v113_v39, 0.15  ;;  %v115_v45 = vadd.f32 %v404_v30, %v98_v19  ;;  %v116_v46 = vadd.f32 %v405_v31, %v99_v22  ;;  %v117_v47 = vadd.f32 %v406_v35, %v100_v32  ;;  %v438_v10 = vld [vmem:[%s781_s0 + $0xa0] sm:$0xff]  ;;  %v439_v11 = vld [vmem:[%s781_s0 + $0xa8] sm:$0xff]  ;;  %v440_v35 = vld [vmem:[%s781_s0 + $0xb0] sm:$0xff] }
   0xd   :  { %580 = vst [vmem:[%s782_s1 + $0x18] sm:$0xff] %v540_v41   ;;  %vm122_vm9 = vcmp.ge.f32.partialorder %v114_v44, 0.15  ;;  %v410_v48 = vsel %vm121_vm8, 1.0, %v594_v5  ;;  %v186_v49 = vsel %vm121_vm8, 0.0, %v113_v39  ;;  %v118_v50 = vadd.f32 %v407_v40, %v101_v33  ;;  %v441_v39 = vld [vmem:[%s781_s0 + $0xb8] sm:$0xff] }
   0xe   :  { %v411_v51 = vsel %vm122_vm9, 1.0, %v594_v5  ;;  %v187_v52 = vsel %vm122_vm9, 0.0, %v114_v44  ;;  %v194_v53 = vmul.f32 0.5, %v186_v49  ;;  %vm123_vm10 = vcmp.ge.f32.partialorder %v115_v45, 0.15  ;;  %v466_v40 = vld [vmem:[%s781_s0 + $0xc0] sm:$0xff] }
   0xf   :  { %v543_v55 = vpack.c.bf16 %v411_v51, %v410_v48  ;;  %v195_v56 = vmul.f32 0.5, %v187_v52  ;;  %vm124_vm11 = vcmp.ge.f32.partialorder %v116_v46, 0.15  ;;  %v412_v57 = vsel %vm123_vm10, 1.0, %v594_v5  ;;  %v467_v44 = vld [vmem:[%s781_s0 + $0xc8] sm:$0xff]  ;;  %v468_v48 = vld [vmem:[%s781_s0 + $0xd0] sm:$0xff] }
  0x10   :  { %v413_v60 = vsel %vm124_vm11, 1.0, %v594_v5  ;;  %v188_v61 = vsel %vm123_vm10, 0.0, %v115_v45  ;;  %v189_v62 = vsel %vm124_vm11, 0.0, %v116_v46  ;;  %vm125_vm12 = vcmp.ge.f32.partialorder %v117_v47, 0.15  ;;  %v469_v49 = vld [vmem:[%s781_s0 + $0xd8] sm:$0xff] }
  0x11   :  { %581 = vst [vmem:[%s782_s1 + $0x20] sm:$0xff] %v543_v55   ;;  %v546_v0 = vpack.c.bf16 %v413_v60, %v412_v57  ;;  %v196_v1 = vmul.f32 0.5, %v188_v61  ;;  %v197_v2 = vmul.f32 0.5, %v189_v62  ;;  %vm126_vm13 = vcmp.ge.f32.partialorder %v118_v50, 0.15  ;;  %v471_v55 = vld [vmem:[%s781_s0 + $0xe8] sm:$0xff] }
  0x12   :  { %v414_v6 = vsel %vm125_vm12, 1.0, %v594_v5  ;;  %v415_v7 = vsel %vm126_vm13, 1.0, %v594_v5  ;;  %v190_v8 = vsel %vm125_vm12, 0.0, %v117_v47  ;;  %v191_v9 = vsel %vm126_vm13, 0.0, %v118_v50 }
  0x13   :  { %582 = vst [vmem:[%s782_s1 + $0x28] sm:$0xff] %v546_v0   ;;  %v549_v12 = vpack.c.bf16 %v415_v7, %v414_v6  ;;  %v198_v13 = vmul.f32 0.5, %v190_v8  ;;  %v199_v14 = vmul.f32 0.5, %v191_v9  ;;  %v119_v15 = vadd.f32 %v408_v54, %v102_v42  ;;  %v470_v54 = vld [vmem:[%s781_s0 + $0xe0] sm:$0xff] }
  0x14   :  { %v120_v16 = vadd.f32 %v409_v58, %v103_v43  ;;  %v211_v17 = vadd.f32 %v434_v59, %v194_v53  ;;  %v212_v18 = vadd.f32 %v435_v63, %v195_v56  ;;  %v213_v19 = vadd.f32 %v436_v3, %v196_v1 }
  0x15   :  { %583 = vst [vmem:[%s782_s1 + $0x30] sm:$0xff] %v549_v12   ;;  %vm127_vm14 = vcmp.ge.f32.partialorder %v119_v15, 0.15  ;;  %v214_v20 = vadd.f32 %v437_v4, %v197_v2  ;;  %v215_v21 = vadd.f32 %v438_v10, %v198_v13  ;;  %v216_v22 = vadd.f32 %v439_v11, %v199_v14  ;;  %v472_v13 = vld [vmem:[%s781_s0 + $0xf0] sm:$0xff]  ;;  %v473_v14 = vld [vmem:[%s781_s0 + $0xf8] sm:$0xff] }
  0x16   :  { %vm128_vm15 = vcmp.ge.f32.partialorder %v120_v16, 0.15  ;;  %v416_v23 = vsel %vm127_vm14, 1.0, %v594_v5  ;;  %v192_v24 = vsel %vm127_vm14, 0.0, %v119_v15  ;;  %vm219_vm0 = vcmp.ge.f32.partialorder %v211_v17, 0.15 }
  0x17   :  { %v417_v25 = vsel %vm128_vm15, 1.0, %v594_v5  ;;  %v193_v26 = vsel %vm128_vm15, 0.0, %v120_v16  ;;  %v200_v27 = vmul.f32 0.5, %v192_v24  ;;  %vm220_vm1 = vcmp.ge.f32.partialorder %v212_v18, 0.15 }
  0x18   :  { %v552_v28 = vpack.c.bf16 %v417_v25, %v416_v23  ;;  %v201_v29 = vmul.f32 0.5, %v193_v26  ;;  %v442_v30 = vsel %vm219_vm0, 1.0, %v594_v5  ;;  %v443_v31 = vsel %vm220_vm1, 1.0, %v594_v5 }
  0x19   :  { %v555_v32 = vpack.c.bf16 %v443_v31, %v442_v30  ;;  %v284_v33 = vsel %vm219_vm0, 0.0, %v211_v17  ;;  %v285_v34 = vsel %vm220_vm1, 0.0, %v212_v18  ;;  %vm221_vm2 = vcmp.ge.f32.partialorder %v213_v19, 0.15 }
  0x1a   :  { %584 = vst [vmem:[%s782_s1 + $0x38] sm:$0xff] %v552_v28   ;;  %v292_v36 = vmul.f32 0.5, %v284_v33  ;;  %v293_v37 = vmul.f32 0.5, %v285_v34  ;;  %vm222_vm3 = vcmp.ge.f32.partialorder %v214_v20, 0.15  ;;  %v444_v38 = vsel %vm221_vm2, 1.0, %v594_v5 }
  0x1b   :  { %585 = vst [vmem:[%s782_s1 + $0x40] sm:$0xff] %v555_v32   ;;  %v445_v41 = vsel %vm222_vm3, 1.0, %v594_v5  ;;  %v286_v42 = vsel %vm221_vm2, 0.0, %v213_v19  ;;  %v287_v43 = vsel %vm222_vm3, 0.0, %v214_v20  ;;  %vm223_vm4 = vcmp.ge.f32.partialorder %v215_v21, 0.15 }
  0x1c   :  { %v558_v45 = vpack.c.bf16 %v445_v41, %v444_v38  ;;  %v294_v46 = vmul.f32 0.5, %v286_v42  ;;  %v295_v47 = vmul.f32 0.5, %v287_v43  ;;  %vm224_vm5 = vcmp.ge.f32.partialorder %v216_v22, 0.15 }
  0x1d   :  { %v446_v50 = vsel %vm223_vm4, 1.0, %v594_v5  ;;  %v447_v51 = vsel %vm224_vm5, 1.0, %v594_v5  ;;  %v288_v52 = vsel %vm223_vm4, 0.0, %v215_v21  ;;  %v289_v53 = vsel %vm224_vm5, 0.0, %v216_v22 }
  0x1e   :  { %586 = vst [vmem:[%s782_s1 + $0x48] sm:$0xff] %v558_v45   ;;  %v561_v56 = vpack.c.bf16 %v447_v51, %v446_v50  ;;  %v296_v57 = vmul.f32 0.5, %v288_v52  ;;  %v297_v58 = vmul.f32 0.5, %v289_v53  ;;  %v217_v59 = vadd.f32 %v440_v35, %v200_v27 }
  0x1f   :  { %v218_v60 = vadd.f32 %v441_v39, %v201_v29  ;;  %v309_v61 = vadd.f32 %v466_v40, %v292_v36  ;;  %v310_v62 = vadd.f32 %v467_v44, %v293_v37  ;;  %v311_v63 = vadd.f32 %v468_v48, %v294_v46 }
  0x20   :  { %587 = vst [vmem:[%s782_s1 + $0x50] sm:$0xff] %v561_v56   ;;  %vm225_vm6 = vcmp.ge.f32.partialorder %v217_v59, 0.15  ;;  %v312_v0 = vadd.f32 %v469_v49, %v295_v47  ;;  %v313_v1 = vadd.f32 %v470_v54, %v296_v57  ;;  %v314_v2 = vadd.f32 %v471_v55, %v297_v58 }
  0x21   :  { %vm226_vm7 = vcmp.ge.f32.partialorder %v218_v60, 0.15  ;;  %v448_v3 = vsel %vm225_vm6, 1.0, %v594_v5  ;;  %v290_v4 = vsel %vm225_vm6, 0.0, %v217_v59  ;;  %vm317_vm8 = vcmp.ge.f32.partialorder %v309_v61, 0.15 }
  0x22   :  { %v449_v6 = vsel %vm226_vm7, 1.0, %v594_v5  ;;  %v291_v7 = vsel %vm226_vm7, 0.0, %v218_v60  ;;  %v298_v8 = vmul.f32 0.5, %v290_v4  ;;  %vm318_vm9 = vcmp.ge.f32.partialorder %v310_v62, 0.15 }
  0x23   :  { %v564_v9 = vpack.c.bf16 %v449_v6, %v448_v3  ;;  %v299_v10 = vmul.f32 0.5, %v291_v7  ;;  %v474_v11 = vsel %vm317_vm8, 1.0, %v594_v5  ;;  %v475_v12 = vsel %vm318_vm9, 1.0, %v594_v5 }
  0x24   :  { %v567_v15 = vpack.c.bf16 %v475_v12, %v474_v11  ;;  %vm319_vm10 = vcmp.ge.f32.partialorder %v311_v63, 0.15  ;;  %vm320_vm11 = vcmp.ge.f32.partialorder %v312_v0, 0.15  ;;  %vm321_vm12 = vcmp.ge.f32.partialorder %v313_v1, 0.15 }
  0x25   :  { %588 = vst [vmem:[%s782_s1 + $0x58] sm:$0xff] %v564_v9   ;;  %v476_v16 = vsel %vm319_vm10, 1.0, %v594_v5  ;;  %v477_v17 = vsel %vm320_vm11, 1.0, %v594_v5  ;;  %vm322_vm13 = vcmp.ge.f32.partialorder %v314_v2, 0.15  ;;  %v478_v18 = vsel %vm321_vm12, 1.0, %v594_v5 }
  0x26   :  { %589 = vst [vmem:[%s782_s1 + $0x60] sm:$0xff] %v567_v15   ;;  %v570_v19 = vpack.c.bf16 %v477_v17, %v476_v16  ;;  %v479_v20 = vsel %vm322_vm13, 1.0, %v594_v5  ;;  %v315_v21 = vadd.f32 %v472_v13, %v298_v8  ;;  %v316_v22 = vadd.f32 %v473_v14, %v299_v10 }
  0x27   :  { %v573_v23 = vpack.c.bf16 %v479_v20, %v478_v18 }
  0x28   :  { %590 = vst [vmem:[%s782_s1 + $0x68] sm:$0xff] %v570_v19   ;;  %vm323_vm14 = vcmp.ge.f32.partialorder %v315_v21, 0.15  ;;  %vm324_vm15 = vcmp.ge.f32.partialorder %v316_v22, 0.15 }
  0x29   :  { %591 = vst [vmem:[%s782_s1 + $0x70] sm:$0xff] %v573_v23   ;;  %v480_v24 = vsel %vm323_vm14, 1.0, %v594_v5  ;;  %v481_v25 = vsel %vm324_vm15, 1.0, %v594_v5 }
  0x2a   :  { %v576_v26 = vpack.c.bf16 %v481_v25, %v480_v24 }
  0x2c   :  { %592 = vst [vmem:[%s782_s1 + $0x78] sm:$0xff] %v576_v26  }

// kernel: downsampling_forward.3
= control target key start
LH: loop header
LB: loop body
LE: loop exit
PB: predicated region body
PF: predicated region fallthrough
CT: control target
= control target key end

     0   :  { %vm250_vm0 = vcmask 130048   ;;  %s674_s1 = inlined_call_operand.vmem [shape: bf16[144,512], index: 1, kind: input, shape index: {}]   ;;  %s675_s0 = inlined_call_operand.vmem [shape: bf16[32,144], index: 0, kind: input, shape index: {}]   ;;  %s676_s2 = inlined_call_operand.vmem [shape: f32[32,512], index: 2, kind: output, shape index: {}]  }
   0x1   :  { %v427_v0 = vld [vmem:[%s674_s1 + $0xe4] ss:$16 sps:$4 sm:$0xff]   ;;  %v429_v1 = vld [vmem:[%s674_s1 + $0xec] ss:$16 sps:$4 sm:$0xff]   ;;  %v431_v2 = vld [vmem:[%s674_s1 + $0xe0] ss:$16 sps:$4 sm:$0xff]  }
   0x2   :  { %257 = vmatprep.subr.bf16.mxu0 %v427_v0  ;;  %v432_v3 = vld [vmem:[%s674_s1 + $0xe8] ss:$16 sps:$4 sm:$0xff]   ;;  %310 = vmatprep.subr.bf16.mxu1 %v429_v1  ;;  %v433_v4 = vld [vmem:[%s674_s1 + $0xc4] ss:$16 sps:$4 sm:$0xff]   ;;  %v435_v5 = vld [vmem:[%s674_s1 + $0xcc] ss:$16 sps:$4 sm:$0xff]  }
   0x3   :  { %258 = vmatpush1.bf16.msra.mxu0 %v431_v2  ;;  %311 = vmatpush1.bf16.msra.mxu1 %v432_v3  ;;  %v437_v6 = vld [vmem:[%s674_s1 + $0xc0] ss:$16 sps:$4 sm:$0xff]   ;;  %v438_v7 = vld [vmem:[%s674_s1 + $0xc8] ss:$16 sps:$4 sm:$0xff]   ;;  %v439_v8 = vld [vmem:[%s674_s1 + $0xa4] ss:$16 sps:$4 sm:$0xff]  }
   0x4   :  { %259 = vmatprep.subr.bf16.mxu0 %v433_v4  ;;  %312 = vmatprep.subr.bf16.mxu1 %v435_v5  ;;  %v441_v9 = vld [vmem:[%s674_s1 + $0xac] ss:$16 sps:$4 sm:$0xff]   ;;  %v443_v10 = vld [vmem:[%s674_s1 + $0xa0] ss:$16 sps:$4 sm:$0xff]   ;;  %v444_v11 = vld [vmem:[%s674_s1 + $0xa8] ss:$16 sps:$4 sm:$0xff]  }
   0x5   :  { %v445_v12 = vld [vmem:[%s674_s1 + $0x84] ss:$16 sps:$4 sm:$0xff]   ;;  %v447_v13 = vld [vmem:[%s674_s1 + $0x8c] ss:$16 sps:$4 sm:$0xff]   ;;  %v449_v14 = vld [vmem:[%s674_s1 + $0x80] ss:$16 sps:$4 sm:$0xff]  }
   0x6   :  { %v450_v15 = vld [vmem:[%s674_s1 + $0x88] ss:$16 sps:$4 sm:$0xff]   ;;  %v451_v16 = vld [vmem:[%s674_s1 + $0x64] ss:$16 sps:$4 sm:$0xff]   ;;  %v453_v17 = vld [vmem:[%s674_s1 + $0x6c] ss:$16 sps:$4 sm:$0xff]  }
   0x7   :  { %260 = vmatpush1.bf16.msra.mxu0 %v437_v6  ;;  %313 = vmatpush1.bf16.msra.mxu1 %v438_v7  ;;  %v455_v18 = vld [vmem:[%s674_s1 + $0x60] ss:$16 sps:$4 sm:$0xff]   ;;  %v456_v19 = vld [vmem:[%s674_s1 + $0x68] ss:$16 sps:$4 sm:$0xff]   ;;  %v457_v20 = vld [vmem:[%s674_s1 + $0x44] ss:$16 sps:$4 sm:$0xff]  }
   0x8   :  { %261 = vmatprep.subr.bf16.mxu0 %v439_v8  ;;  %314 = vmatprep.subr.bf16.mxu1 %v441_v9  ;;  %v459_v21 = vld [vmem:[%s674_s1 + $0x4c] ss:$16 sps:$4 sm:$0xff]   ;;  %v461_v22 = vld [vmem:[%s674_s1 + $0x40] ss:$16 sps:$4 sm:$0xff]   ;;  %v462_v23 = vld [vmem:[%s674_s1 + $0x48] ss:$16 sps:$4 sm:$0xff]  }
   0x9   :  { %v463_v24 = vld [vmem:[%s674_s1 + $0x24] ss:$16 sps:$4 sm:$0xff]   ;;  %v465_v25 = vld [vmem:[%s674_s1 + $0x2c] ss:$16 sps:$4 sm:$0xff]   ;;  %v467_v26 = vld [vmem:[%s674_s1 + $0x20] ss:$16 sps:$4 sm:$0xff]  }
   0xa   :  { %v468_v27 = vld [vmem:[%s674_s1 + $0x28] ss:$16 sps:$4 sm:$0xff]   ;;  %v469_v28 = vld [vmem:[%s674_s1 + $0x4] ss:$16 sps:$4 sm:$0xff]   ;;  %v471_v29 = vld [vmem:[%s674_s1 + $0xc] ss:$16 sps:$4 sm:$0xff]  }
   0xb   :  { %262 = vmatpush1.bf16.msra.mxu0 %v443_v10  ;;  %315 = vmatpush1.bf16.msra.mxu1 %v444_v11  ;;  %v483_v30 = vld [vmem:[%s675_s0 + $0x4] ss:$8 sps:$4 sm:$0xff]   ;;  %v473_v31 = vld [vmem:[%s674_s1] ss:$16 sps:$4 sm:$0xff]   ;;  %v474_v32 = vld [vmem:[%s674_s1 + $0x8] ss:$16 sps:$4 sm:$0xff]  }
   0xc   :  { %263 = vmatprep.subr.bf16.mxu0 %v445_v12  ;;  %316 = vmatprep.subr.bf16.mxu1 %v447_v13  ;;  %v475_v33 = vld [vmem:[%s674_s1 + $0x104] ss:$16 sps:$4 sm:$0xff]   ;;  %v477_v34 = vld [vmem:[%s674_s1 + $0x10c] ss:$16 sps:$4 sm:$0xff]   ;;  %v479_v35 = vld [vmem:[%s674_s1 + $0x100] ss:$16 sps:$4 sm:$0xff]  }
   0xd   :  { %423 = vmatprep.mubr.msk.bf16.mxu0 %vm250_vm0, %v483_v30  ;;  %425 = vmatprep.mubr.msk.bf16.mxu1 %vm250_vm0, %v483_v30  ;;  %v480_v36 = vld [vmem:[%s674_s1 + $0x108] ss:$16 sps:$4 sm:$0xff]   ;;  %v484_v38 = vld [vmem:[%s675_s0 + $0x14] ss:$8 sps:$4 sm:$0xff]  }
   0xe   :  { %v481_v37 = vld [vmem:[%s675_s0] ss:$8 sps:$4 sm:$0xff]   ;;  %v486_v39 = vld [vmem:[%s675_s0 + $0x10] ss:$8 sps:$4 sm:$0xff]  }
   0xf   :  { %264 = vmatpush1.bf16.msra.mxu0 %v449_v14  ;;  %317 = vmatpush1.bf16.msra.mxu1 %v450_v15 }
  0x10   :  { %265 = vmatprep.subr.bf16.mxu0 %v451_v16  ;;  %318 = vmatprep.subr.bf16.mxu1 %v453_v17 }
  0x13   :  { %266 = vmatpush1.bf16.msra.mxu0 %v455_v18  ;;  %319 = vmatpush1.bf16.msra.mxu1 %v456_v19 }
  0x14   :  { %267 = vmatprep.subr.bf16.mxu0 %v457_v20  ;;  %320 = vmatprep.subr.bf16.mxu1 %v459_v21 }
  0x17   :  { %268 = vmatpush1.bf16.msra.mxu0 %v461_v22  ;;  %321 = vmatpush1.bf16.msra.mxu1 %v462_v23 }
  0x18   :  { %269 = vmatprep.subr.bf16.mxu0 %v463_v24  ;;  %322 = vmatprep.subr.bf16.mxu1 %v465_v25 }
  0x1b   :  { %270 = vmatpush1.bf16.msra.mxu0 %v467_v26  ;;  %323 = vmatpush1.bf16.msra.mxu1 %v468_v27 }
  0x1c   :  { %271 = vmatprep.subr.bf16.mxu0 %v469_v28  ;;  %324 = vmatprep.subr.bf16.mxu1 %v471_v29 }
  0x1f   :  { %272 = vmatpush1.bf16.msra.mxu0 %v473_v31  ;;  %325 = vmatpush1.bf16.msra.mxu1 %v474_v32 }
  0x20   :  { %287 = vmatprep.subr.bf16.mxu0 %v475_v33  ;;  %340 = vmatprep.subr.bf16.mxu1 %v477_v34 }
  0x23   :  { %288 = vmatpush2.bf16.msra.mxu0 %v479_v35  ;;  %341 = vmatpush2.bf16.msra.mxu1 %v480_v36 }
  0x26   :  { %290 = vmatmul.mubr.bf16.vlgmr.msra.gmra.mxu0 %v481_v37  ;;  %343 = vmatmul.mubr.bf16.vlgmr.msra.gmra.mxu1 %v481_v37 }
  0x27   :  { %424 = vmatprep.mubr.msk.bf16.mxu0 %vm250_vm0, %v484_v38  ;;  %426 = vmatprep.mubr.msk.bf16.mxu1 %vm250_vm0, %v484_v38 }
  0x2e   :  { %300 = vmatmul.mubr.bf16.gmra.mxu0 %v486_v39  ;;  %353 = vmatmul.mubr.bf16.gmra.mxu1 %v486_v39 }
  0xe6   :  { %v291_v40 = vpop.f32.mrf.mxu0  ;;  %v344_v41 = vpop.f32.mrf.mxu1 }
  0xe7   :  { %363 = vst [vmem:[%s676_s2] sm:$0xff] %v291_v40  ;;  %365 = vst [vmem:[%s676_s2 + $0x10] sm:$0xff] %v344_v41 }
  0xe8   :  { %v293_v42 = vpop.f32.mrf.mxu0  ;;  %v346_v43 = vpop.f32.mrf.mxu1 }
  0xe9   :  { %364 = vst [vmem:[%s676_s2 + $0x8] sm:$0xff] %v293_v42  ;;  %366 = vst [vmem:[%s676_s2 + $0x18] sm:$0xff] %v346_v43 }
  0xea   :  { %v295_v44 = vpop.f32.mrf.mxu0  ;;  %v348_v45 = vpop.f32.mrf.mxu1 }
  0xeb   :  { %367 = vst [vmem:[%s676_s2 + $0x20] sm:$0xff] %v295_v44  ;;  %369 = vst [vmem:[%s676_s2 + $0x30] sm:$0xff] %v348_v45 }
  0xec   :  { %v297_v46 = vpop.f32.mrf.mxu0  ;;  %v350_v47 = vpop.f32.mrf.mxu1 }
  0xed   :  { %368 = vst [vmem:[%s676_s2 + $0x28] sm:$0xff] %v297_v46  ;;  %370 = vst [vmem:[%s676_s2 + $0x38] sm:$0xff] %v350_v47 }
  0xee   :  { %v301_v48 = vpop.f32.mrf.mxu0  ;;  %v354_v49 = vpop.f32.mrf.mxu1 }
  0xef   :  { %371 = vst [vmem:[%s676_s2 + $0x40] sm:$0xff] %v301_v48  ;;  %373 = vst [vmem:[%s676_s2 + $0x50] sm:$0xff] %v354_v49 }
  0xf0   :  { %v303_v50 = vpop.f32.mrf.mxu0  ;;  %v356_v51 = vpop.f32.mrf.mxu1 }
  0xf1   :  { %372 = vst [vmem:[%s676_s2 + $0x48] sm:$0xff] %v303_v50  ;;  %374 = vst [vmem:[%s676_s2 + $0x58] sm:$0xff] %v356_v51 }
  0xf2   :  { %v305_v52 = vpop.f32.mrf.mxu0  ;;  %v358_v53 = vpop.f32.mrf.mxu1 }
  0xf3   :  { %375 = vst [vmem:[%s676_s2 + $0x60] sm:$0xff] %v305_v52  ;;  %377 = vst [vmem:[%s676_s2 + $0x70] sm:$0xff] %v358_v53 }
  0xf4   :  { %v307_v54 = vpop.f32.mrf.mxu0  ;;  %v360_v55 = vpop.f32.mrf.mxu1 }
  0xf5   :  { %376 = vst [vmem:[%s676_s2 + $0x68] sm:$0xff] %v307_v54  ;;  %378 = vst [vmem:[%s676_s2 + $0x78] sm:$0xff] %v360_v55 }

</bundles_post_ra>
